<compile_context>
chip_gen: v5e
topology: v5e:2x2
jax: 0.10.0
libtpu: 0.0.40
codegen_flags: <defaults>
</compile_context>

<pallas_src>
import jax
import jax.numpy as jnp
from jax.experimental import pallas as pl
from jax.experimental.pallas import tpu as pltpu

H1, H2 = 128, 64   # hidden sizes fixed by the PyTorch module


def _round_up(n, m):
    return ((n + m - 1) // m) * m


def mlp_kernel(x_ref, w1_ref, b1_ref, w2_ref, b2_ref, w3_ref, b3_ref, o_ref):
    # x arrives in its original dtype; casting the VMEM tile to the matmul dtype is
    # free VPU work and avoids a separate wrapper-side HBM pass over x.
    x = x_ref[...].astype(w1_ref.dtype)
    # Layer 1: Linear(input_size, 128) + ReLU (MXU matmul, f32 accumulate).
    h1 = jnp.dot(x, w1_ref[...], preferred_element_type=jnp.float32)
    h1 = jnp.maximum(h1 + b1_ref[...], 0.0)
    # TODO(synk): Dropout(0.3) is identity in eval mode; training-mode dropout with
    # PyTorch-matching RNG is not reproduced here.
    # Layer 2: Linear(128, 64) + ReLU.
    h2 = jnp.dot(h1.astype(w2_ref.dtype), w2_ref[...],
                 preferred_element_type=jnp.float32)
    h2 = jnp.maximum(h2 + b2_ref[...], 0.0)
    # Layer 3: Linear(64, num_classes), stored unpadded (a masked narrow store is far
    # cheaper than padding to 128 f32 columns and re-slicing the slab in HBM).
    out = jnp.dot(h2.astype(w3_ref.dtype), w3_ref[...],
                  preferred_element_type=jnp.float32)
    o_ref[...] = (out + b3_ref[...]).astype(o_ref.dtype)


def _choose_batch_tile(batch, batch_tile):
    # Multiple of 16 keeps bf16 x tiles sublane-dense (and is a multiple of 8 for f32).
    tb = min(batch_tile, _round_up(batch, 16))
    # v7x shards the "parallel" grid axis across its 2 TensorCores: make sure there
    # are >= 2 grid steps when the batch is big enough to split (no-op on v5e/v6e).
    if batch > 16 and pl.cdiv(batch, tb) < 2:
        tb = _round_up(pl.cdiv(batch, 2), 16)
    return tb


def mlp_classifier_forward(x, params, *, batch_tile=1024, matmul_dtype=jnp.bfloat16):
    """Fused MLP forward. x: (B, input_size). Returns (B, num_classes) f32 logits."""
    w1t, b1, w2t, b2, w3t, b3 = (
        params["w1t"], params["b1"], params["w2t"],
        params["b2"], params["w3t"], params["b3"],
    )
    B, in_size = x.shape
    num_classes = w3t.shape[1]

    tb = _choose_batch_tile(B, batch_tile)
    n_tiles = pl.cdiv(B, tb)   # ragged last tile handled by Pallas partial blocks

    # Weights are tiny (~53 KB total) and reused every grid step: cast once here.
    w1m = w1t.astype(matmul_dtype)
    w2m = w2t.astype(matmul_dtype)
    w3m = w3t.astype(matmul_dtype)

    # Constant index_map -> weights/biases stay VMEM-resident across grid steps.
    # (pipeline_mode=pl.Buffered(1) could also drop their second pipeline buffer,
    # ~53 KB; left at the default depth to stay on the well-trodden lowering path.)
    const = lambda shape: pl.BlockSpec(shape, lambda i: (0, 0))

    mm_bytes = jnp.dtype(matmul_dtype).itemsize
    flops = 2 * B * (in_size * H1 + H1 * H2 + H2 * num_classes)
    bytes_accessed = int(
        x.size * x.dtype.itemsize                       # x streamed as-is (cast in-kernel)
        + (w1m.size + w2m.size + w3m.size) * mm_bytes   # resident weights (read once)
        + (b1.size + b2.size + b3.size) * 4             # f32 biases
        + B * num_classes * 4                           # unpadded f32 output
    )

    return pl.pallas_call(
        mlp_kernel,
        out_shape=jax.ShapeDtypeStruct((B, num_classes), jnp.float32),
        grid=(n_tiles,),
        in_specs=[
            pl.BlockSpec((tb, in_size), lambda i: (i, 0)),   # x: streamed per batch tile
            const(w1m.shape), const(b1.shape),               # params: VMEM-resident
            const(w2m.shape), const(b2.shape),
            const(w3m.shape), const(b3.shape),
        ],
        out_specs=pl.BlockSpec((tb, num_classes), lambda i: (i, 0)),
        compiler_params=pltpu.CompilerParams(
            # Shard the batch axis across v7x's 2 TensorCores; harmless on v5e/v6e.
            # No vmem_limit_bytes override: the per-tile working set is a few MiB,
            # far below the default scoped limit on every generation.
            dimension_semantics=("parallel",),
        ),
        cost_estimate=pl.CostEstimate(
            flops=flops, transcendentals=0, bytes_accessed=bytes_accessed),
    )(x, w1m, b1, w2m, b2, w3m, b3)


def init_params(key, input_size, num_classes):
    """Deterministic init mirroring PyTorch nn.Linear bounds (weights stored transposed)."""
    def linear_init(k, fan_in, fan_out):
        k_w, k_b = jax.random.split(k)
        bound = 1.0 / jnp.sqrt(fan_in)
        # PyTorch stores weight as (out, in); we keep the (in, out) transpose so the
        # kernel computes y = x @ W.T + b without an in-kernel transpose.
        w_t = jax.random.uniform(k_w, (fan_in, fan_out), jnp.float32, -bound, bound)
        b = jax.random.uniform(k_b, (1, fan_out), jnp.float32, -bound, bound)
        return w_t, b

    k1, k2, k3 = jax.random.split(key, 3)
    w1t, b1 = linear_init(k1, input_size, H1)
    w2t, b2 = linear_init(k2, H1, H2)
    w3t, b3 = linear_init(k3, H2, num_classes)
    return {"w1t": w1t, "b1": b1, "w2t": w2t, "b2": b2, "w3t": w3t, "b3": b3}


def reference_forward(x, params):
    """Pure-JAX f32 reference (HIGHEST matmul precision), PyTorch eval-mode semantics."""
    hi = jax.lax.Precision.HIGHEST
    h1 = jnp.maximum(jnp.dot(x, params["w1t"], precision=hi) + params["b1"], 0.0)
    h2 = jnp.maximum(jnp.dot(h1, params["w2t"], precision=hi) + params["b2"], 0.0)
    return jnp.dot(h2, params["w3t"], precision=hi) + params["b3"]


if __name__ == "__main__":
    key = jax.random.PRNGKey(0)
    k_param, k_x = jax.random.split(key)

    batch = 32          # small test batch (multiple of 16 -> 2 grid tiles)
    input_size = 40     # e.g. 40 MFCC features per clip
    num_classes = 10

    params = init_params(k_param, input_size, num_classes)
    x = jax.random.normal(k_x, (batch, input_size), jnp.float32)
    ref = reference_forward(x, params)

    # f32-operand path: semantics check vs the PyTorch-equivalent reference
    # (tolerance covers possible multi-pass MXU rounding of f32 matmuls).
    out_f32 = jax.block_until_ready(
        mlp_classifier_forward(x, params, matmul_dtype=jnp.float32))
    assert out_f32.shape == (batch, num_classes)
    assert jnp.allclose(out_f32, ref, atol=5e-3, rtol=5e-3), "f32 path mismatch"

    # Optimized default path: bf16 MXU operands, f32 accumulate/bias/ReLU.
    out_bf16 = jax.block_until_ready(mlp_classifier_forward(x, params))
    assert out_bf16.shape == (batch, num_classes)
    assert jnp.allclose(out_bf16, ref, atol=3e-2, rtol=3e-2), "bf16 path mismatch"

    # Ragged batch (not a tile multiple): handled by the partial edge block -- no
    # jnp.pad / output-slice passes in the wrapper.
    x_ragged = x[:13]
    out_ragged = jax.block_until_ready(mlp_classifier_forward(x_ragged, params))
    assert out_ragged.shape == (13, num_classes)
    assert jnp.allclose(out_ragged, ref[:13], atol=3e-2, rtol=3e-2), "ragged mismatch"

    print("KERNEL_OK")
</pallas_src>

<mosaic_0001>
module attributes {stable_mosaic.version = 11 : i64} {
  func.func @mlp_kernel(%arg0: i32, %arg1: memref<16x40xf32, #tpu.memory_space<vmem>>, %arg2: memref<40x128xf32, #tpu.memory_space<vmem>>, %arg3: memref<1x128xf32, #tpu.memory_space<vmem>>, %arg4: memref<128x64xf32, #tpu.memory_space<vmem>>, %arg5: memref<1x64xf32, #tpu.memory_space<vmem>>, %arg6: memref<64x10xf32, #tpu.memory_space<vmem>>, %arg7: memref<1x10xf32, #tpu.memory_space<vmem>>, %arg8: memref<16x10xf32, #tpu.memory_space<vmem>>) attributes {dimension_semantics = [#tpu.dimension_semantics<parallel>], iteration_bounds = array<i64: 2>, scalar_prefetch = 0 : i64, scratch_operands = 0 : i64, tpu.core_type = #tpu.core_type<tc>, window_params = [{transform_indices = @transform_0, window_bounds = array<i64: 16, 40>}, {pipeline_mode = #tpu.pipeline_mode<synchronous>, transform_indices = @transform_1, window_bounds = array<i64: 40, 128>}, {pipeline_mode = #tpu.pipeline_mode<synchronous>, transform_indices = @transform_2, window_bounds = array<i64: 1, 128>}, {pipeline_mode = #tpu.pipeline_mode<synchronous>, transform_indices = @transform_3, window_bounds = array<i64: 128, 64>}, {pipeline_mode = #tpu.pipeline_mode<synchronous>, transform_indices = @transform_4, window_bounds = array<i64: 1, 64>}, {pipeline_mode = #tpu.pipeline_mode<synchronous>, transform_indices = @transform_5, window_bounds = array<i64: 64, 10>}, {pipeline_mode = #tpu.pipeline_mode<synchronous>, transform_indices = @transform_6, window_bounds = array<i64: 1, 10>}, {transform_indices = @transform_7, window_bounds = array<i64: 16, 10>}]} {
    %c0 = arith.constant 0 : index
    %c0_0 = arith.constant 0 : index
    %0 = vector.load %arg1[%c0, %c0_0] : memref<16x40xf32, #tpu.memory_space<vmem>>, vector<16x40xf32>
    %c0_1 = arith.constant 0 : index
    %c0_2 = arith.constant 0 : index
    %1 = vector.load %arg2[%c0_1, %c0_2] : memref<40x128xf32, #tpu.memory_space<vmem>>, vector<40x128xf32>
    %cst = arith.constant dense<0.000000e+00> : vector<16x128xf32>
    %2 = tpu.matmul %0, %1, %cst {dimension_numbers = #tpu.dot_dimension_numbers<[1], [0], [0], [1], [0, 0, 1, 1], [], []>} : vector<16x40xf32>, vector<40x128xf32>, vector<16x128xf32> -> vector<16x128xf32>
    %c0_3 = arith.constant 0 : index
    %c0_4 = arith.constant 0 : index
    %3 = vector.load %arg3[%c0_3, %c0_4] : memref<1x128xf32, #tpu.memory_space<vmem>>, vector<1x128xf32>
    %4 = vector.broadcast %3 : vector<1x128xf32> to vector<16x128xf32>
    %5 = arith.addf %2, %4 : vector<16x128xf32>
    %cst_5 = arith.constant 0.000000e+00 : f32
    %6 = vector.broadcast %cst_5 : f32 to vector<16x128xf32>
    %7 = arith.maximumf %5, %6 : vector<16x128xf32>
    %c0_6 = arith.constant 0 : index
    %c0_7 = arith.constant 0 : index
    %8 = vector.load %arg4[%c0_6, %c0_7] : memref<128x64xf32, #tpu.memory_space<vmem>>, vector<128x64xf32>
    %cst_8 = arith.constant dense<0.000000e+00> : vector<16x64xf32>
    %9 = tpu.matmul %7, %8, %cst_8 {dimension_numbers = #tpu.dot_dimension_numbers<[1], [0], [0], [1], [0, 0, 1, 1], [], []>} : vector<16x128xf32>, vector<128x64xf32>, vector<16x64xf32> -> vector<16x64xf32>
    %c0_9 = arith.constant 0 : index
    %c0_10 = arith.constant 0 : index
    %10 = vector.load %arg5[%c0_9, %c0_10] : memref<1x64xf32, #tpu.memory_space<vmem>>, vector<1x64xf32>
    %11 = vector.broadcast %10 : vector<1x64xf32> to vector<16x64xf32>
    %12 = arith.addf %9, %11 : vector<16x64xf32>
    %cst_11 = arith.constant 0.000000e+00 : f32
    %13 = vector.broadcast %cst_11 : f32 to vector<16x64xf32>
    %14 = arith.maximumf %12, %13 : vector<16x64xf32>
    %c0_12 = arith.constant 0 : index
    %c0_13 = arith.constant 0 : index
    %15 = vector.load %arg6[%c0_12, %c0_13] : memref<64x10xf32, #tpu.memory_space<vmem>>, vector<64x10xf32>
    %cst_14 = arith.constant dense<0.000000e+00> : vector<16x10xf32>
    %16 = tpu.matmul %14, %15, %cst_14 {dimension_numbers = #tpu.dot_dimension_numbers<[1], [0], [0], [1], [0, 0, 1, 1], [], []>} : vector<16x64xf32>, vector<64x10xf32>, vector<16x10xf32> -> vector<16x10xf32>
    %c0_15 = arith.constant 0 : index
    %c0_16 = arith.constant 0 : index
    %17 = vector.load %arg7[%c0_15, %c0_16] : memref<1x10xf32, #tpu.memory_space<vmem>>, vector<1x10xf32>
    %18 = vector.broadcast %17 : vector<1x10xf32> to vector<16x10xf32>
    %19 = arith.addf %16, %18 : vector<16x10xf32>
    %c0_17 = arith.constant 0 : index
    %c0_18 = arith.constant 0 : index
    %20 = vector.load %arg8[%c0_17, %c0_18] : memref<16x10xf32, #tpu.memory_space<vmem>>, vector<16x10xf32>
    tpu.vector_store %arg8[%c0_17, %c0_18], %19 {strides = array<i32>} : memref<16x10xf32, #tpu.memory_space<vmem>>, vector<16x10xf32>,
    return
  }
  func.func @transform_0(%arg0: i32) -> (i32, i32) {
    %c0_i32 = arith.constant 0 : i32
    %c0_i32_0 = arith.constant 0 : i32
    return %arg0, %c0_i32 : i32, i32
  }
  func.func @transform_1(%arg0: i32) -> (i32, i32) {
    %c0_i32 = arith.constant 0 : i32
    %c0_i32_0 = arith.constant 0 : i32
    %c0_i32_1 = arith.constant 0 : i32
    return %c0_i32, %c0_i32_0 : i32, i32
  }
  func.func @transform_2(%arg0: i32) -> (i32, i32) {
    %c0_i32 = arith.constant 0 : i32
    %c0_i32_0 = arith.constant 0 : i32
    %c0_i32_1 = arith.constant 0 : i32
    return %c0_i32, %c0_i32_0 : i32, i32
  }
  func.func @transform_3(%arg0: i32) -> (i32, i32) {
    %c0_i32 = arith.constant 0 : i32
    %c0_i32_0 = arith.constant 0 : i32
    %c0_i32_1 = arith.constant 0 : i32
    return %c0_i32, %c0_i32_0 : i32, i32
  }
  func.func @transform_4(%arg0: i32) -> (i32, i32) {
    %c0_i32 = arith.constant 0 : i32
    %c0_i32_0 = arith.constant 0 : i32
    %c0_i32_1 = arith.constant 0 : i32
    return %c0_i32, %c0_i32_0 : i32, i32
  }
  func.func @transform_5(%arg0: i32) -> (i32, i32) {
    %c0_i32 = arith.constant 0 : i32
    %c0_i32_0 = arith.constant 0 : i32
    %c0_i32_1 = arith.constant 0 : i32
    return %c0_i32, %c0_i32_0 : i32, i32
  }
  func.func @transform_6(%arg0: i32) -> (i32, i32) {
    %c0_i32 = arith.constant 0 : i32
    %c0_i32_0 = arith.constant 0 : i32
    %c0_i32_1 = arith.constant 0 : i32
    return %c0_i32, %c0_i32_0 : i32, i32
  }
  func.func @transform_7(%arg0: i32) -> (i32, i32) {
    %c0_i32 = arith.constant 0 : i32
    %c0_i32_0 = arith.constant 0 : i32
    return %arg0, %c0_i32 : i32, i32
  }
}

</mosaic_0001>

<bundles_post_ra>
// kernel: tpu_custom_call.1
= control target key start
LH: loop header
LB: loop body
LE: loop exit
PB: predicated region body
PF: predicated region fallthrough
CT: control target
= control target key end

     0   :  { %s561_s24 = smov 0   ;;  %s683_s0 = inlined_call_operand.vmem [shape: f32[32,40], index: 0, kind: input, shape index: {}]   ;;  %s684_s1 = inlined_call_operand.vmem [shape: f32[40,128], index: 1, kind: input, shape index: {}]   ;;  %s685_s2 = inlined_call_operand.vmem [shape: f32[1,128], index: 2, kind: input, shape index: {}]   ;;  %s686_s3 = inlined_call_operand.vmem [shape: f32[128,64], index: 3, kind: input, shape index: {}]   ;;  %s687_s4 = inlined_call_operand.vmem [shape: f32[1,64], index: 4, kind: input, shape index: {}]   ;;  %s688_s5 = inlined_call_operand.vmem [shape: f32[64,10], index: 5, kind: input, shape index: {}]   ;;  %s689_s6 = inlined_call_operand.vmem [shape: f32[1,10], index: 6, kind: input, shape index: {}]   ;;  %s690_s7 = inlined_call_operand.vmem [shape: f32[32,10], index: 7, kind: output, shape index: {}]  }
   0x1 LB: > { %s471_s25 = sadd.s32 4294967295, %s519_s24   ;;  %p475_p0 = scmp.ge.s32.totalorder %s519_s24, 1  ;;  %s519_s24 = sphi %s561_s24, %s17_s24  }
   0x2   : > { %p238_p1 = scmp.lt.s32.totalorder %s519_s24, 3 }
   0x4   : > { %p239_p2 = pnand %p475_p0, %p238_p1 }
   0x5   : > { %s476_s30 = sshll.u32 (!%p239_p2), %s471_s25, 1 }
   0x6   : > { %242 = sbr.rel (%p239_p2) target bundleno = 430 (0x1ae), region = 48  ;;  %p271_p3 = scmp.lt.s32.totalorder (!%p239_p2), %s476_s30, 3 }
   0xb   : > { %v288_v0 = vld [vmem:[%s684_s1 + $0x20] sm:$0xff]  ;;  %v287_v1 = vld [vmem:[%s684_s1 + $0x18] sm:$0xff]  ;;  %v286_v3 = vld [vmem:[%s684_s1 + $0x10] sm:$0xff]  ;;  %s692_s30 = smov (!%p271_p3, %s476_s30), 3  ;;  %vm293_vm0 = vcmask 326656   ;;  %vm382_vm1 = vcmask 523264  }
   0xc   : > { %311 = vmatpush.msra.mxu0 %v288_v0  ;;  %v340_v2 = vld [vmem:[%s686_s3 + $0x78] sm:$0xff]  ;;  %v339_v4 = vld [vmem:[%s686_s3 + $0x70] sm:$0xff]  ;;  %v338_v5 = vld [vmem:[%s686_s3 + $0x68] sm:$0xff]  ;;  %s477_s18 = sshll.u32 %s692_s30, 3  ;;  %vm412_vm2 = vcmask 80896  }
   0xd   : > { %345 = vmatpush.msra.mxu1 %v340_v2  ;;  %486 = vmatpush.msra.mxu3 %v340_v2  ;;  %v285_v6 = vld [vmem:[%s684_s1 + $0x8] sm:$0xff]  ;;  %v337_v7 = vld [vmem:[%s686_s3 + $0x60] sm:$0xff]  ;;  %s274_s26 = scalar_lea.vmem %s683_s0, %s477_s18  ;;  %v336_v10 = vld [vmem:[%s686_s3 + $0x58] sm:$0xff]  ;;  %s280_s13 = scalar_lea.vmem %s690_s7, %s477_s18 }
   0xe   : > { %312 = vmatpush.msra.mxu0 %v287_v1  ;;  %v284_v8 = vld [vmem:[%s684_s1] sm:$0xff]  ;;  %v335_v11 = vld [vmem:[%s686_s3 + $0x50] sm:$0xff]  ;;  %v334_v12 = vld [vmem:[%s686_s3 + $0x48] sm:$0xff] }
   0xf   : > { %346 = vmatpush.msra.mxu1 %v339_v4  ;;  %487 = vmatpush.msra.mxu3 %v339_v4  ;;  %v282_v9 = vld [vmem:[%s274_s26] sm:$0xff]  ;;  %v283_v14 = vld [vmem:[%s274_s26 + $0x8] sm:$0xff]  ;;  %v332_v15 = vld [vmem:[%s686_s3 + $0x38] sm:$0xff] }
  0x10   : > { %313 = vmatpush.msra.mxu0 %v286_v3  ;;  %v333_v13 = vld [vmem:[%s686_s3 + $0x40] sm:$0xff]  ;;  %v331_v16 = vld [vmem:[%s686_s3 + $0x30] sm:$0xff]  ;;  %v330_v17 = vld [vmem:[%s686_s3 + $0x28] sm:$0xff] }
  0x11   : > { %347 = vmatpush.msra.mxu1 %v338_v5  ;;  %488 = vmatpush.msra.mxu3 %v338_v5  ;;  %v329_v18 = vld [vmem:[%s686_s3 + $0x20] sm:$0xff]  ;;  %v328_v19 = vld [vmem:[%s686_s3 + $0x18] sm:$0xff]  ;;  %v327_v20 = vld [vmem:[%s686_s3 + $0x10] sm:$0xff] }
  0x12   : > { %314 = vmatpush.msra.mxu0 %v285_v6  ;;  %v326_v21 = vld [vmem:[%s686_s3 + $0x8] sm:$0xff]  ;;  %v325_v22 = vld [vmem:[%s686_s3] sm:$0xff]  ;;  %v377_v23 = vld [vmem:[%s688_s5 + $0x38] sm:$0xff] }
  0x13   : > { %348 = vmatpush.msra.mxu1 %v337_v7  ;;  %489 = vmatpush.msra.mxu3 %v337_v7  ;;  %v376_v24 = vld [vmem:[%s688_s5 + $0x30] sm:$0xff]  ;;  %v375_v25 = vld [vmem:[%s688_s5 + $0x28] sm:$0xff]  ;;  %v374_v26 = vld [vmem:[%s688_s5 + $0x20] sm:$0xff] }
  0x14   : > { %315 = vmatpush.msra.mxu0 %v284_v8  ;;  %397 = vmatpush.msra.mxu2 %v377_v23  ;;  %v373_v27 = vld [vmem:[%s688_s5 + $0x18] sm:$0xff]  ;;  %v510_v28 = vld [vmem:[%s685_s2] ss:$0 sm:$0xff]  ;;  %v372_v35 = vld [vmem:[%s688_s5 + $0x10] sm:$0xff] }
  0x15   : > { %480 = vmatmul.msk.f32.vlgmr.msra.gmra.mxu0 %vm293_vm0, %v282_v9  ;;  %349 = vmatpush.msra.mxu1 %v336_v10  ;;  %v371_v36 = vld [vmem:[%s688_s5 + $0x8] sm:$0xff]  ;;  %v370_v37 = vld [vmem:[%s688_s5] sm:$0xff] }
  0x16   : > { %490 = vmatpush.msra.mxu3 %v336_v10  ;;  %398 = vmatpush.msra.mxu2 %v376_v24  ;;  %v511_v38 = vld [vmem:[%s687_s4] ss:$0 sm:$0xff] }
  0x17   : > { %350 = vmatpush.msra.mxu1 %v335_v11  ;;  %v512_v45 = vld [vmem:[%s689_s6] ss:$0 sm:$0xff] }
  0x18   : > { %491 = vmatpush.msra.mxu3 %v335_v11  ;;  %399 = vmatpush.msra.mxu2 %v375_v25 }
  0x19   : > { %351 = vmatpush.msra.mxu1 %v334_v12 }
  0x1a   : > { %492 = vmatpush.msra.mxu3 %v334_v12  ;;  %400 = vmatpush.msra.mxu2 %v374_v26 }
  0x1b   : > { %352 = vmatpush.msra.mxu1 %v333_v13 }
  0x1c   : > { %493 = vmatpush.msra.mxu3 %v333_v13  ;;  %401 = vmatpush.msra.mxu2 %v373_v27 }
  0x1d   : > { %481 = vmatmul.msk.f32.gmra.mxu0 %vm293_vm0, %v283_v14  ;;  %353 = vmatpush.msra.mxu1 %v332_v15 }
  0x1e   : > { %494 = vmatpush.msra.mxu3 %v332_v15  ;;  %402 = vmatpush.msra.mxu2 %v372_v35 }
  0x1f   : > { %354 = vmatpush.msra.mxu1 %v331_v16 }
  0x20   : > { %495 = vmatpush.msra.mxu3 %v331_v16  ;;  %403 = vmatpush.msra.mxu2 %v371_v36 }
  0x21   : > { %355 = vmatpush.msra.mxu1 %v330_v17 }
  0x22   : > { %496 = vmatpush.msra.mxu3 %v330_v17  ;;  %404 = vmatpush.msra.mxu2 %v370_v37 }
  0x23   : > { %356 = vmatpush.msra.mxu1 %v329_v18 }
  0x24   : > { %497 = vmatpush.msra.mxu3 %v329_v18 }
  0x25   : > { %357 = vmatpush.msra.mxu1 %v328_v19 }
  0x26   : > { %498 = vmatpush.msra.mxu3 %v328_v19 }
  0x27   : > { %358 = vmatpush.msra.mxu1 %v327_v20 }
  0x28   : > { %499 = vmatpush.msra.mxu3 %v327_v20 }
  0x29   : > { %359 = vmatpush.msra.mxu1 %v326_v21 }
  0x2a   : > { %500 = vmatpush.msra.mxu3 %v326_v21 }
  0x2b   : > { %360 = vmatpush.msra.mxu1 %v325_v22 }
  0x2c   : > { %501 = vmatpush.msra.mxu3 %v325_v22 }
  0x92   : > { %v317_v29 = vpop.f32.mrf.mxu0 }
  0x93   : > { %v318_v30 = vadd.f32 %v510_v28, %v317_v29 }
  0x95   : > { %v323_v31 = vmax.f32 %v318_v30, 0.0 }
  0x97   : > { %361 = vmatmul.f32.vlgmr.msra.gmra.mxu1 %v323_v31 }
  0x9a   : > { %v320_v32 = vpop.f32.mrf.mxu0 }
  0x9b   : > { %v321_v33 = vadd.f32 %v510_v28, %v320_v32 }
  0x9d   : > { %v324_v34 = vmax.f32 %v321_v33, 0.0 }
  0x9f   : > { %364 = vmatmul.f32.vlgmr.msra.gmra.mxu3 %v324_v34 }
 0x114   : > { %v362_v39 = vpop.f32.mrf.mxu1 }
 0x115   : > { %v363_v40 = vadd.f32 %v511_v38, %v362_v39 }
 0x117   : > { %v368_v41 = vmax.f32 %v363_v40, 0.0 }
 0x119   : > { %482 = vmatmul.msk.f32.vlgmr.msra.gmra.mxu2 %vm382_vm1, %v368_v41 }
 0x122   : > { %v365_v42 = vpop.f32.mrf.mxu3 }
 0x123   : > { %v366_v43 = vadd.f32 %v511_v38, %v365_v42 }
 0x125   : > { %v369_v44 = vmax.f32 %v366_v43, 0.0 }
 0x127   : > { %483 = vmatmul.msk.f32.gmra.mxu2 %vm382_vm1, %v369_v44 }
 0x19c   : > { %v406_v46 = vpop.f32.mrf.mxu2 }
 0x19d   : > { %v407_v47 = vadd.f32 %v512_v45, %v406_v46 }
 0x19f   : > { %413 = vst.msk [vmem:[%s280_s13] sm:$0xff] %vm412_vm2, %v407_v47 }
 0x1aa   : > { %v409_v48 = vpop.f32.mrf.mxu2 }
 0x1ab   : > { %v410_v49 = vadd.f32 %v512_v45, %v409_v48 }
 0x1ad   : > { %414 = vst.msk [vmem:[%s280_s13 + $0x8] sm:$0xff] %vm412_vm2, %v410_v49 }
 0x1ae PF: > { %s17_s24 = sadd.s32 1, %s519_s24  }
 0x1af   : > { %p14_p4 = scmp.ge.s32.totalorder %s17_s24, 4  }
 0x1b1   :  { %16 = sbr.rel (!%p14_p4) target bundleno = 1 (0x1), region = 78 }

</bundles_post_ra>
